<compile_context>
chip_gen: v6e
topology: v6e:2x2x1
jax: 0.10.0
libtpu: 0.0.40
codegen_flags: <defaults>
</compile_context>

<pallas_src>
import functools

import jax
import jax.numpy as jnp
from jax import lax
from jax.experimental import pallas as pl
from jax.experimental.pallas import tpu as pltpu

_MAX_TILE_ROWS = 1024  # 0.5 MiB f32 per x tile; safe on v5e/v6e/v7x VMEM


def _make_lossB_kernel(batch_size: int, tile_rows: int, r: float):
    inv_r = 1.0 / float(r)
    inv_b = 1.0 / float(batch_size)
    needs_mask = (batch_size % tile_rows) != 0  # ragged last tile?

    def kernel(x_ref, w_ref, y_ref, b_ref, out_ref):
        # x_ref: (Tr, 128) VMEM   w_ref: (2, 128) VMEM   y_ref: (1, Tr) VMEM
        # b_ref: (2,)      SMEM   out_ref: (1, 1)  SMEM (resident accumulator)
        t = pl.program_id(0)
        nt = pl.num_programs(0)

        @pl.when(t == 0)
        def _init():
            out_ref[0, 0] = 0.0

        x = x_ref[...].astype(jnp.float32)          # in-kernel upcast: HBM
        w = w_ref[...].astype(jnp.float32)          # traffic stays in caller
        y = y_ref[...].astype(jnp.float32)          # dtype (bf16 ok)

        b_diff = b_ref[1] - b_ref[0]                # scalar from SMEM
        w_diff = w[1:2, :] - w[0:1, :]              # (1, 128), one vreg sub

        # Lane-dense logit difference on the MXU: (1,128) · (Tr,128)ᵀ -> (1,Tr)
        d = lax.dot_general(
            w_diff, x,
            dimension_numbers=(((1,), (1,)), ((), ())),
            preferred_element_type=jnp.float32)
        d = (d + b_diff) * inv_r                    # (1, Tr), lane-dense

        if needs_mask:
            row = t * tile_rows + lax.broadcasted_iota(jnp.int32, d.shape, 1)
            valid = row < batch_size
            d = jnp.where(valid, d, 0.0)            # also kills any ragged NaN
            y = jnp.where(valid, y, 0.0)

        # Numerically stable softplus(d) = max(d,0) + log1p(exp(-|d|))
        sp = jnp.maximum(d, 0.0) + jnp.log1p(jnp.exp(-jnp.abs(d)))

        # log p1 = log sigmoid(d),  log(1-p1) = log sigmoid(-d)
        # Clamp at -100 to stay comparable with PyTorch nn.BCELoss.
        log_p1 = jnp.maximum(d - sp, -100.0)
        log_p0 = jnp.maximum(-sp, -100.0)

        per_elem = -(y * log_p1 + (1.0 - y) * log_p0)
        if needs_mask:
            per_elem = jnp.where(valid, per_elem, 0.0)

        out_ref[0, 0] += jnp.sum(per_elem)          # partial sum, this tile

        @pl.when(t == nt - 1)
        def _finalize():
            out_ref[0, 0] = out_ref[0, 0] * inv_b   # mean over global batch

    return kernel


@functools.partial(jax.jit, static_argnames=("r",))
def lossB_forward(x, labels, W, bias, r=1.0):
    """x: (B, 1, 128) or (B, 128); labels: (B,); W: (2, 128); bias: (2,)."""
    if x.ndim == 3:
        x = x[:, 0, :]                              # squeeze(1)
    B, D = x.shape
    y = labels.reshape(1, B).astype(jnp.float32)    # lane-dense labels (1, B)

    tile_rows = B if B <= _MAX_TILE_ROWS else _MAX_TILE_ROWS
    num_tiles = pl.cdiv(B, tile_rows)

    kernel = _make_lossB_kernel(B, tile_rows, float(r))

    out = pl.pallas_call(
        kernel,
        out_shape=jax.ShapeDtypeStruct((1, 1), jnp.float32),
        grid=(num_tiles,),
        in_specs=[
            pl.BlockSpec((tile_rows, D), lambda t: (t, 0)),   # x tile  (Tr,128)
            pl.BlockSpec((2, D), lambda t: (0, 0)),           # W (resident)
            pl.BlockSpec((1, tile_rows), lambda t: (0, t)),   # labels  (1,Tr)
            pl.BlockSpec(memory_space=pltpu.SMEM),            # bias (2,) scalar
        ],
        out_specs=pl.BlockSpec(memory_space=pltpu.SMEM),      # scalar loss
        compiler_params=pltpu.CompilerParams(
            dimension_semantics=("arbitrary",)),              # batch reduction
    )(x, W, y, bias.astype(jnp.float32))
    return out[0, 0]


def _reference_loss(x, labels, W, bias, r=1.0):
    """Pure-JAX reference: the original softmax + BCE formulation."""
    xr = x[:, 0, :] if x.ndim == 3 else x
    z = xr.astype(jnp.float32) @ W.T.astype(jnp.float32) + bias.astype(jnp.float32)
    p = jax.nn.softmax(z / r, axis=-1)[:, 1]
    yf = labels.astype(jnp.float32)
    return jnp.mean(-(yf * jnp.maximum(jnp.log(p), -100.0)
                      + (1.0 - yf) * jnp.maximum(jnp.log(1.0 - p), -100.0)))


if __name__ == "__main__":
    key = jax.random.PRNGKey(0)
    k_x, k_y, k_w, k_b, k_x2, k_y2 = jax.random.split(key, 6)

    # Deterministic nn.Linear(128, 2) init: U(-1/sqrt(128), 1/sqrt(128))
    bound = 1.0 / jnp.sqrt(128.0)
    W = jax.random.uniform(k_w, (2, 128), minval=-bound, maxval=bound,
                           dtype=jnp.float32)
    bias = jax.random.uniform(k_b, (2,), minval=-bound, maxval=bound,
                              dtype=jnp.float32)

    # Small case, consistent with forward: x (B, 1, 128), labels (B,) in {0,1}
    B = 8
    x = jax.random.normal(k_x, (B, 1, 128), dtype=jnp.float32)
    labels = jax.random.bernoulli(k_y, 0.5, (B,)).astype(jnp.int32)

    loss = lossB_forward(x, labels, W, bias, r=1.0)
    jax.block_until_ready(loss)
    ref = _reference_loss(x, labels, W, bias, r=1.0)
    assert jnp.allclose(loss, ref, atol=1e-5, rtol=1e-5), (loss, ref)

    # Exercise the tiled + ragged-masked path (2 tiles, partial last tile).
    B2 = 1300
    x2 = jax.random.normal(k_x2, (B2, 1, 128), dtype=jnp.float32)
    labels2 = jax.random.bernoulli(k_y2, 0.5, (B2,)).astype(jnp.int32)
    loss2 = lossB_forward(x2, labels2, W, bias, r=2.0)
    jax.block_until_ready(loss2)
    ref2 = _reference_loss(x2, labels2, W, bias, r=2.0)
    assert jnp.allclose(loss2, ref2, atol=1e-5, rtol=1e-5), (loss2, ref2)

    print("KERNEL_OK")
</pallas_src>

<mosaic_0001>
module attributes {stable_mosaic.version = 11 : i64} {
  func.func @kernel(%arg0: i32, %arg1: memref<8x128xf32, #tpu.memory_space<vmem>>, %arg2: memref<2x128xf32, #tpu.memory_space<vmem>>, %arg3: memref<1x8xf32, #tpu.memory_space<vmem>>, %arg4: memref<2xf32, #tpu.memory_space<smem>>, %arg5: memref<1x1xf32, #tpu.memory_space<smem>>) attributes {dimension_semantics = [#tpu.dimension_semantics<arbitrary>], iteration_bounds = array<i64: 1>, scalar_prefetch = 0 : i64, scratch_operands = 0 : i64, tpu.core_type = #tpu.core_type<tc>, window_params = [{transform_indices = @transform_0, window_bounds = array<i64: 8, 128>}, {pipeline_mode = #tpu.pipeline_mode<synchronous>, transform_indices = @transform_1, window_bounds = array<i64: 2, 128>}, {transform_indices = @transform_2, window_bounds = array<i64: 1, 8>}, {transform_indices = @transform_3, window_bounds = array<i64: 2>}, {transform_indices = @transform_4, window_bounds = array<i64: 1, 1>}]} {
    %c0_i32 = arith.constant 0 : i32
    %0 = arith.cmpi eq, %arg0, %c0_i32 : i32
    %1 = arith.extui %0 : i1 to i32
    %c0_i32_0 = arith.constant 0 : i32
    %2 = arith.cmpi ne, %1, %c0_i32_0 : i32
    scf.if %2 {
      %cst_22 = arith.constant 0.000000e+00 : f32
      %c0_23 = arith.constant 0 : index
      %c0_24 = arith.constant 0 : index
      %49 = memref.load %arg5[%c0_23, %c0_24] : memref<1x1xf32, #tpu.memory_space<smem>>
      memref.store %cst_22, %arg5[%c0_23, %c0_24] : memref<1x1xf32, #tpu.memory_space<smem>>
    } else {
    }
    %c0 = arith.constant 0 : index
    %c0_1 = arith.constant 0 : index
    %3 = vector.load %arg1[%c0, %c0_1] : memref<8x128xf32, #tpu.memory_space<vmem>>, vector<8x128xf32>
    %c0_2 = arith.constant 0 : index
    %c0_3 = arith.constant 0 : index
    %4 = vector.load %arg2[%c0_2, %c0_3] : memref<2x128xf32, #tpu.memory_space<vmem>>, vector<2x128xf32>
    %c0_4 = arith.constant 0 : index
    %c0_5 = arith.constant 0 : index
    %5 = vector.load %arg3[%c0_4, %c0_5] : memref<1x8xf32, #tpu.memory_space<vmem>>, vector<1x8xf32>
    %c1 = arith.constant 1 : index
    %6 = memref.load %arg4[%c1] : memref<2xf32, #tpu.memory_space<smem>>
    %c0_6 = arith.constant 0 : index
    %7 = memref.load %arg4[%c0_6] : memref<2xf32, #tpu.memory_space<smem>>
    %8 = arith.subf %6, %7 : f32
    %9 = vector.extract_strided_slice %4 {offsets = [1, 0], sizes = [1, 128], strides = [1, 1]} : vector<2x128xf32> to vector<1x128xf32>
    %10 = vector.extract_strided_slice %4 {offsets = [0, 0], sizes = [1, 128], strides = [1, 1]} : vector<2x128xf32> to vector<1x128xf32>
    %11 = arith.subf %9, %10 : vector<1x128xf32>
    %cst = arith.constant dense<0.000000e+00> : vector<1x8xf32>
    %12 = tpu.matmul %11, %3, %cst {dimension_numbers = #tpu.dot_dimension_numbers<[1], [1], [0], [0], [0, 0, 1, 0], [], []>} : vector<1x128xf32>, vector<8x128xf32>, vector<1x8xf32> -> vector<1x8xf32>
    %13 = vector.broadcast %8 : f32 to vector<1x8xf32>
    %14 = arith.addf %12, %13 : vector<1x8xf32>
    %cst_7 = arith.constant 1.000000e+00 : f32
    %15 = vector.broadcast %cst_7 : f32 to vector<1x8xf32>
    %16 = arith.mulf %14, %15 : vector<1x8xf32>
    %cst_8 = arith.constant 0.000000e+00 : f32
    %17 = vector.broadcast %cst_8 : f32 to vector<1x8xf32>
    %18 = arith.maximumf %16, %17 : vector<1x8xf32>
    %19 = math.absf %16 : vector<1x8xf32>
    %cst_9 = arith.constant 0.000000e+00 : f32
    %20 = vector.broadcast %cst_9 : f32 to vector<1x8xf32>
    %21 = arith.subf %20, %19 : vector<1x8xf32>
    %22 = math.exp %21 : vector<1x8xf32>
    %23 = math.log1p %22 : vector<1x8xf32>
    %24 = arith.addf %18, %23 : vector<1x8xf32>
    %25 = arith.subf %16, %24 : vector<1x8xf32>
    %cst_10 = arith.constant -1.000000e+02 : f32
    %26 = vector.broadcast %cst_10 : f32 to vector<1x8xf32>
    %27 = arith.maximumf %25, %26 : vector<1x8xf32>
    %cst_11 = arith.constant 0.000000e+00 : f32
    %28 = vector.broadcast %cst_11 : f32 to vector<1x8xf32>
    %29 = arith.subf %28, %24 : vector<1x8xf32>
    %cst_12 = arith.constant -1.000000e+02 : f32
    %30 = vector.broadcast %cst_12 : f32 to vector<1x8xf32>
    %31 = arith.maximumf %29, %30 : vector<1x8xf32>
    %32 = arith.mulf %5, %27 : vector<1x8xf32>
    %cst_13 = arith.constant 1.000000e+00 : f32
    %33 = vector.broadcast %cst_13 : f32 to vector<1x8xf32>
    %34 = arith.subf %33, %5 : vector<1x8xf32>
    %35 = arith.mulf %34, %31 : vector<1x8xf32>
    %36 = arith.addf %32, %35 : vector<1x8xf32>
    %cst_14 = arith.constant 0.000000e+00 : f32
    %37 = vector.broadcast %cst_14 : f32 to vector<1x8xf32>
    %38 = arith.subf %37, %36 : vector<1x8xf32>
    %c0_15 = arith.constant 0 : index
    %c0_16 = arith.constant 0 : index
    %39 = memref.load %arg5[%c0_15, %c0_16] : memref<1x1xf32, #tpu.memory_space<smem>>
    %40 = vector.shape_cast %38 : vector<1x8xf32> to vector<1x1x8xf32>
    %cst_17 = arith.constant dense<0.000000e+00> : vector<1xf32>
    %41 = vector.multi_reduction <add>, %40, %cst_17 [1, 2] : vector<1x1x8xf32> to vector<1xf32>
    %42 = vector.shape_cast %41 : vector<1xf32> to vector<1x1x1xf32>
    %43 = vector.extract %42[0, 0, 0] : f32 from vector<1x1x1xf32>
    %44 = arith.addf %39, %43 : f32
    %c0_18 = arith.constant 0 : index
    %c0_19 = arith.constant 0 : index
    %45 = memref.load %arg5[%c0_18, %c0_19] : memref<1x1xf32, #tpu.memory_space<smem>>
    memref.store %44, %arg5[%c0_18, %c0_19] : memref<1x1xf32, #tpu.memory_space<smem>>
    %c0_i32_20 = arith.constant 0 : i32
    %46 = arith.cmpi eq, %arg0, %c0_i32_20 : i32
    %47 = arith.extui %46 : i1 to i32
    %c0_i32_21 = arith.constant 0 : i32
    %48 = arith.cmpi ne, %47, %c0_i32_21 : i32
    scf.if %48 {
      %c0_22 = arith.constant 0 : index
      %c0_23 = arith.constant 0 : index
      %49 = memref.load %arg5[%c0_22, %c0_23] : memref<1x1xf32, #tpu.memory_space<smem>>
      %cst_24 = arith.constant 1.250000e-01 : f32
      %50 = arith.mulf %49, %cst_24 : f32
      %c0_25 = arith.constant 0 : index
      %c0_26 = arith.constant 0 : index
      %51 = memref.load %arg5[%c0_25, %c0_26] : memref<1x1xf32, #tpu.memory_space<smem>>
      memref.store %50, %arg5[%c0_25, %c0_26] : memref<1x1xf32, #tpu.memory_space<smem>>
    } else {
    }
    return
  }
  func.func @transform_0(%arg0: i32) -> (i32, i32) {
    %c0_i32 = arith.constant 0 : i32
    %c0_i32_0 = arith.constant 0 : i32
    return %arg0, %c0_i32 : i32, i32
  }
  func.func @transform_1(%arg0: i32) -> (i32, i32) {
    %c0_i32 = arith.constant 0 : i32
    %c0_i32_0 = arith.constant 0 : i32
    %c0_i32_1 = arith.constant 0 : i32
    return %c0_i32, %c0_i32_0 : i32, i32
  }
  func.func @transform_2(%arg0: i32) -> (i32, i32) {
    %c0_i32 = arith.constant 0 : i32
    %c0_i32_0 = arith.constant 0 : i32
    return %c0_i32, %arg0 : i32, i32
  }
  func.func @transform_3(%arg0: i32) -> i32 {
    %c0_i32 = arith.constant 0 : i32
    %c0_i32_0 = arith.constant 0 : i32
    return %c0_i32 : i32
  }
  func.func @transform_4(%arg0: i32) -> (i32, i32) {
    %c0_i32 = arith.constant 0 : i32
    %c0_i32_0 = arith.constant 0 : i32
    %c0_i32_1 = arith.constant 0 : i32
    return %c0_i32, %c0_i32_0 : i32, i32
  }
}

</mosaic_0001>

<bundles_post_ra>
// kernel: lossB_forward.1
= control target key start
LH: loop header
LB: loop body
LE: loop exit
PB: predicated region body
PF: predicated region fallthrough
CT: control target
= control target key end

     0   :  { %9 = vsyncpa [#allocation3], 0  ;;  %s304_s0 = inlined_call_operand.hbm [shape: f32[8,128], index: 0, kind: input, shape index: {}]   ;;  %s305_s1 = inlined_call_operand.vmem [shape: f32[2,128], index: 1, kind: input, shape index: {}]   ;;  %s306_s2 = inlined_call_operand.vmem [shape: f32[1,8], index: 2, kind: input, shape index: {}]   ;;  %s307_s3 = inlined_call_operand.vmem [shape: f32[2], index: 3, kind: input, shape index: {}]   ;;  %s308_s4 = inlined_call_operand.hbm [shape: f32[1,1], index: 4, kind: output, shape index: {}]  }
   0x1   :  { %10 = vsyncpa [#allocation5], 0 }
   0x2   :  { %11 = vsyncpa [#allocation4], 0  ;;  %s32_s17 = sshll.u32 %s307_s3, 4  ;;  %s259_s18 = smov [#allocation2]   ;;  %s33_s17 = int_to_ptr.vmem [resolvable:$true] %s32_s17 }
   0x3   :  { %s18_s19 = sshll.u32 %s259_s18, 4  ;;  %s19_s19 = int_to_ptr.vmem [resolvable:$true] %s18_s19 }
   0x4   :  { %s221_s20 = scalar_lea.vmem %s19_s19, 128  ;;  %p226_p1 = scmp.lt.s32.totalorder %s19_s19, %s19_s19 }
   0x5   :  { %p222_p0 = scmp.ne.s32.totalorder %s19_s19, %s221_s20  ;;  %p227_p2 = scmp.lt.s32.totalorder %s221_s20, %s221_s20 }
   0x7   :  { %p228_p3 = por %p227_p2, %p226_p1 }
   0x9   :  { %p229_p4 = pnand %p228_p3, %p222_p0 }
   0xb   :  { %232 = shalt.err (!%p229_p4)
}
   0xc   :  { %21 = dma.hbm_to_vmem [thread:$0]  %s304_s0, 128, %s19_s19, [#allocation3]  }
   0xd   :  { %s233_s23 = scalar_lea.vmem %s33_s17, 16  ;;  %p238_p6 = scmp.lt.s32.totalorder %s33_s17, %s33_s17 }
   0xe   :  { %p234_p5 = scmp.ne.s32.totalorder %s33_s17, %s233_s23  ;;  %p239_p7 = scmp.lt.s32.totalorder %s233_s23, %s233_s23 }
  0x10   :  { %p240_p8 = por %p239_p7, %p238_p6 }
  0x12   :  { %p241_p9 = pnand %p240_p8, %p234_p5 }
  0x14   :  { %244 = shalt.err (!%p241_p9)
}
  0x15   :  { %s260_s3 = smov [#allocation6]  }
  0x16   :  { %35 = dma.vmem_to_smem %s33_s17, 16, %s260_s3, [#allocation5]  }
  0x17   :  { %253 = dma.done.wait [#allocation3], 128  }
  0x18   :  { %254 = vsyncadd [#allocation3], 4294967168 }
  0x19   :  { %255 = dma.done.wait [#allocation5], 16  }
  0x1a   :  { %256 = vsyncadd [#allocation5], 4294967280 }
  0x1b   :  { %42 = sfence }
  0x1c   :  { %v49_v0 = vld [vmem:[#allocation2] sm:$0xff]  ;;  %v261_v2 = vmov 0.0   ;;  %vm262_vm0 = vmmov 0   ;;  %s193_s0 = sld [smem:[#allocation6 + $0x1]]  ;;  %vm158_vm2 = vcmask 57344   ;;  %s263_s30 = smov [#allocation7]  }
  0x1d   :  { %v50_v1 = vld [vmem:[%s305_s1] sm:$0x3]  ;;  %196 = vmatprep.subr.mxu0 %v261_v2  ;;  %198 = vmatprep.mubr.msk.f32.mxu0 %vm262_vm0, %v261_v2  ;;  %s53_s26 = sld [smem:[#allocation6]] }
  0x1e   :  { %v56_v3 = vrot.slane %v50_v1, 7  ;;  %197 = vmatpush3.xpose.msra.mxu0 %v49_v0  ;;  %v51_v23 = vld [vmem:[%s306_s2] sm:$0x1] }
  0x1f   :  { %v153_v27 = vsub.f32 1.0, %v51_v23 }
  0x20   :  { %v58_v4 = vsub.f32 %v50_v1, %v56_v3 }
  0x22   :  { %v61_v5 = vrot.slane %v58_v4, 1 }
  0x23   :  { %s54_s27 = ssub.f32 %s193_s0, %s53_s26 }
  0x24   :  { %199 = vmatmul.mubr.f32.vlgmr.msra.gmra.mxu0 %v61_v5 }
  0x25   :  { %v59_v6 = vstv %s54_s27 }
  0xe4   :  { %v129_v7 = vpop.f32.mrf.mxu0 }
  0xe5   :  { %v130_v8 = vadd.f32 %v129_v7, %v59_v6 }
  0xe6   :  { %v200_v9 = vpop.f32.mrf.mxu0 }
  0xe7   :  { %v134_v10 = vand.u32 2147483647, %v130_v8  ;;  %v133_v21 = vmax.f32 %v130_v8, 0.0 }
  0xe9   :  { %v135_v11 = vsub.f32 0.0, %v134_v10 }
  0xeb   :  { %v136_v12 = vmul.f32 1.442695, %v135_v11 }
  0xed   :  { %209 = vpow2.f32 %v136_v12 }
  0xfa   :  { %v210_v13 = vpop.eup %209 }
  0xfb   :  { %v138_v14 = vadd.f32 1.0, %v210_v13  ;;  %v141_v15 = vmul.f32 -0.5, %v210_v13  ;;  %v144_v17 = vand.u32 2147483647, %v210_v13 }
  0xfd   :  { %211 = vlog2.f32 %v138_v14  ;;  %v142_v16 = vadd.f32 1.0, %v141_v15  ;;  %vm145_vm1 = vcmp.lt.f32.partialorder %v144_v17, 0.0004427343 }
  0xff   :  { %v143_v20 = vmul.f32 %v210_v13, %v142_v16 }
 0x10a   :  { %v212_v18 = vpop.eup %211 }
 0x10b   :  { %v140_v19 = vmul.f32 0.6931472, %v212_v18 }
 0x10d   :  { %v146_v22 = vsel %vm145_vm1, %v143_v20, %v140_v19 }
 0x10e   :  { %v147_v24 = vadd.f32 %v146_v22, %v133_v21 }
 0x110   :  { %v148_v25 = vsub.f32 %v130_v8, %v147_v24  ;;  %v150_v26 = vsub.f32 0.0, %v147_v24 }
 0x112   :  { %v149_v28 = vmax.f32 %v148_v25, -100.0  ;;  %v151_v29 = vmax.f32 %v150_v26, -100.0 }
 0x114   :  { %v152_v30 = vmul.f32 %v149_v28, %v51_v23  ;;  %v154_v31 = vmul.f32 %v153_v27, %v151_v29 }
 0x116   :  { %v155_v32 = vadd.f32 %v154_v31, %v152_v30 }
 0x118   :  { %v156_v33 = vsub.f32 0.0, %v155_v32 }
 0x11a   :  { %v159_v34 = vsel %vm158_vm2, %v156_v33, 0.0 }
 0x11b   :  { %160 = vadd.xlane.f32.xlu0 %v159_v34 }
 0x1a4   :  { %v161_v35 = vpop.xlane.xlu0 %160 }
 0x1a5   :  { %v162_v36 = vrot.slane %v161_v35, 4 }
 0x1a7   :  { %v163_v37 = vadd.f32 %v162_v36, %v161_v35 }
 0x1a9   :  { %v164_v38 = vrot.slane %v163_v37, 2 }
 0x1ab   :  { %v165_v39 = vadd.f32 %v164_v38, %v163_v37 }
 0x1ad   :  { %v166_v40 = vrot.slane %v165_v39, 1 }
 0x1af   :  { %v167_v41 = vadd.f32 %v166_v40, %v165_v39 }
 0x1b1   :  { %201 = vpush %v167_v41 }
 0x1e2   :  { %s202_s2 = spop %201 }
 0x1e3   :  { %s176_s29 = smul.f32 0.125, %s202_s2 }
 0x1e5   :  { %177 = sst [smem:[#allocation7]] %s176_s29 }
 0x1e6   :  { %185 = dma.smem_to_hbm %s263_s30, 16, %s308_s4, [#allocation4]  }
 0x1e7   :  { %257 = dma.done.wait [#allocation4], 16  }
 0x1e8   :  { %258 = vsyncadd [#allocation4], 4294967280 }
 0x1e9   :  { %189 = sfence }
 0x1ea   :  { %190 = vsyncpa [#allocation3], 1 }
 0x1eb   :  { %191 = vsyncpa [#allocation4], 1 }
 0x1ec   :  { %192 = vsyncpa [#allocation5], 1 }

</bundles_post_ra>
